<compile_context>
chip_gen: v7x
topology: tpu7x:2x2x1
jax: 0.10.0
libtpu: 0.0.40
codegen_flags: <defaults>
</compile_context>

<pallas_src>
import functools

import jax
import jax.numpy as jnp
from jax.experimental import pallas as pl
from jax.experimental.pallas import tpu as pltpu

LANES = 128
TARGET_BLOCK_BYTES = 2 * 1024 * 1024  # ~2 MiB per stream per block


def _sublane_multiple(dtype):
    """Dtype-native sublane packing: 8 rows for 4B, 16 for 2B, 32 for 1B."""
    itemsize = jnp.dtype(dtype).itemsize
    return max(8, 32 // itemsize)


def _range_rescale_kernel(x_ref, o_ref, *, scale, offset, clamp):
    # Affine transform in f32 regardless of input dtype (precision for bf16);
    # compute is ~3 VPU ops/element and nowhere near the HBM bottleneck.
    x = x_ref[...].astype(jnp.float32)
    if clamp:
        x = jnp.clip(x, 0.0, 1.0)
    o_ref[...] = (x * scale + offset).astype(o_ref.dtype)


def range_rescale_forward(x, lb, ub, clamp=True):
    """Apply RangeRescale.forward to an arbitrary-shape array via a Pallas kernel."""
    orig_shape = x.shape
    orig_dtype = x.dtype
    n = x.size
    itemsize = jnp.dtype(orig_dtype).itemsize
    sub = _sublane_multiple(orig_dtype)

    # Static affine coefficients in f32 (lb/ub are module attributes).
    scale = float(ub) - float(lb)
    offset = float(lb)

    # Lane-dense slab: rows of 128 lanes, rows aligned to the dtype-native
    # sublane multiple.
    rows = -(-n // LANES)
    rows = -(-rows // sub) * sub

    # ~2 MiB blocks; for small inputs use a single block covering all rows.
    target_rows = max(sub, (TARGET_BLOCK_BYTES // (LANES * itemsize)) // sub * sub)
    if rows <= target_rows:
        block_rows = rows
    else:
        block_rows = target_rows
        # Pad rows up to an exact multiple of block_rows (no ragged tail block).
        rows = -(-rows // block_rows) * block_rows

    padded = rows * LANES
    x_flat = jnp.reshape(x, (-1,))
    if padded != n:
        # Only pay the pad copy when the size is not already tile-aligned.
        x_flat = jnp.pad(x_flat, (0, padded - n))
    x2d = jnp.reshape(x_flat, (rows, LANES))

    grid = (rows // block_rows,)

    kernel = functools.partial(
        _range_rescale_kernel, scale=scale, offset=offset, clamp=clamp
    )

    out2d = pl.pallas_call(
        kernel,
        out_shape=jax.ShapeDtypeStruct((rows, LANES), orig_dtype),
        grid_spec=pltpu.PrefetchScalarGridSpec(
            num_scalar_prefetch=0,
            grid=grid,
            in_specs=[pl.BlockSpec((block_rows, LANES), lambda i: (i, 0))],
            out_specs=pl.BlockSpec((block_rows, LANES), lambda i: (i, 0)),
        ),
        compiler_params=pltpu.CompilerParams(
            dimension_semantics=("parallel",),
        ),
    )(x2d)

    if padded != n:
        out_flat = jnp.reshape(out2d, (-1,))[:n]
        return jnp.reshape(out_flat, orig_shape)
    return jnp.reshape(out2d, orig_shape)


def _reference_forward(x, lb, ub, clamp=True):
    xf = x.astype(jnp.float32)
    if clamp:
        xf = jnp.clip(xf, 0.0, 1.0)
    return (xf * (float(ub) - float(lb)) + float(lb)).astype(x.dtype)


if __name__ == "__main__":
    key = jax.random.PRNGKey(0)
    lb, ub = -2.0, 3.0

    # Scaled parameter values; spread a bit outside [0, 1] to exercise the clamp.
    x = jax.random.uniform(
        key, (2, 4, 16, 16), dtype=jnp.float32, minval=-0.5, maxval=1.5
    )

    # Main run: clamp=True, aligned f32 input (no pad path).
    out = range_rescale_forward(x, lb, ub, clamp=True)
    out = jax.block_until_ready(out)
    ref = _reference_forward(x, lb, ub, clamp=True)
    assert out.shape == x.shape and out.dtype == x.dtype
    assert jnp.allclose(out, ref, atol=1e-6, rtol=1e-6)

    # clamp=False path.
    out_nc = jax.block_until_ready(range_rescale_forward(x, lb, ub, clamp=False))
    ref_nc = _reference_forward(x, lb, ub, clamp=False)
    assert jnp.allclose(out_nc, ref_nc, atol=1e-6, rtol=1e-6)

    # Non-tile-aligned shape exercises the pad + tail-slice path.
    key2 = jax.random.PRNGKey(0)
    x_odd = jax.random.uniform(
        key2, (3, 5, 7), dtype=jnp.float32, minval=-0.5, maxval=1.5
    )
    out_odd = jax.block_until_ready(range_rescale_forward(x_odd, lb, ub, clamp=True))
    ref_odd = _reference_forward(x_odd, lb, ub, clamp=True)
    assert out_odd.shape == x_odd.shape
    assert jnp.allclose(out_odd, ref_odd, atol=1e-6, rtol=1e-6)

    # bf16 input: affine math in f32 inside the kernel, cast back at the end.
    x_bf16 = x.astype(jnp.bfloat16)
    out_bf = jax.block_until_ready(range_rescale_forward(x_bf16, lb, ub, clamp=True))
    ref_bf = _reference_forward(x_bf16, lb, ub, clamp=True)
    assert out_bf.dtype == jnp.bfloat16
    assert jnp.allclose(
        out_bf.astype(jnp.float32), ref_bf.astype(jnp.float32), atol=2e-2, rtol=2e-2
    )

    print("KERNEL_OK")
</pallas_src>

<mosaic_0001>
module attributes {stable_mosaic.version = 11 : i64} {
  func.func @_range_rescale_kernel(%arg0: i32, %arg1: memref<16x128xf32, #tpu.memory_space<vmem>>, %arg2: memref<16x128xf32, #tpu.memory_space<vmem>>) attributes {dimension_semantics = [#tpu.dimension_semantics<parallel>], iteration_bounds = array<i64: 1>, scalar_prefetch = 0 : i64, scratch_operands = 0 : i64, tpu.core_type = #tpu.core_type<tc>, window_params = [{transform_indices = @transform_0, window_bounds = array<i64: 16, 128>}, {transform_indices = @transform_1, window_bounds = array<i64: 16, 128>}]} {
    %c0 = arith.constant 0 : index
    %c0_0 = arith.constant 0 : index
    %0 = vector.load %arg1[%c0, %c0_0] : memref<16x128xf32, #tpu.memory_space<vmem>>, vector<16x128xf32>
    %cst = arith.constant 0.000000e+00 : f32
    %cst_1 = arith.constant 1.000000e+00 : f32
    %1 = vector.broadcast %cst : f32 to vector<16x128xf32>
    %2 = arith.maximumf %1, %0 : vector<16x128xf32>
    %3 = vector.broadcast %cst_1 : f32 to vector<16x128xf32>
    %4 = arith.minimumf %3, %2 : vector<16x128xf32>
    %cst_2 = arith.constant 5.000000e+00 : f32
    %5 = vector.broadcast %cst_2 : f32 to vector<16x128xf32>
    %6 = arith.mulf %4, %5 : vector<16x128xf32>
    %cst_3 = arith.constant -2.000000e+00 : f32
    %7 = vector.broadcast %cst_3 : f32 to vector<16x128xf32>
    %8 = arith.addf %6, %7 : vector<16x128xf32>
    %c0_4 = arith.constant 0 : index
    %c0_5 = arith.constant 0 : index
    %9 = vector.load %arg2[%c0_4, %c0_5] : memref<16x128xf32, #tpu.memory_space<vmem>>, vector<16x128xf32>
    tpu.vector_store %arg2[%c0_4, %c0_5], %8 {strides = array<i32>} : memref<16x128xf32, #tpu.memory_space<vmem>>, vector<16x128xf32>,
    return
  }
  func.func @transform_0(%arg0: i32) -> (i32, i32) {
    %c0_i32 = arith.constant 0 : i32
    %c0_i32_0 = arith.constant 0 : i32
    return %arg0, %c0_i32 : i32, i32
  }
  func.func @transform_1(%arg0: i32) -> (i32, i32) {
    %c0_i32 = arith.constant 0 : i32
    %c0_i32_0 = arith.constant 0 : i32
    return %arg0, %c0_i32 : i32, i32
  }
}

</mosaic_0001>

<bundles_post_ra>
// kernel: tpu_custom_call.1
= control target key start
LH: loop header
LB: loop body
LE: loop exit
PB: predicated region body
PF: predicated region fallthrough
CT: control target
= control target key end

     0   :  { %6 = vsyncpa [#allocation3], 0  ;;  %s148_s0 = inlined_call_operand.hbm [shape: f32[16,128], index: 0, kind: input, shape index: {}]   ;;  %s149_s1 = inlined_call_operand.hbm [shape: f32[16,128], index: 1, kind: output, shape index: {}]  }
   0x1   :  { %7 = vsyncpa [#allocation4], 0  ;;  %s104_s6 = smov [#allocation2]   ;;  %s56_s10 = scalar_lea.hbm %s148_s0, 256 }
   0x2   :  { %s13_s7 = sshll.u32 %s104_s6, 4  ;;  %p57_p0 = scmp.ne.s32.totalorder %s148_s0, %s56_s10  ;;  %s14_s7 = int_to_ptr.vmem [resolvable:$true] %s13_s7 }
   0x3   :  { %p60_p1 = scmp.lt.u32.totalorder %s56_s10, %s148_s0 }
   0x5   :  { %p62_p2 = pnand %p60_p1, %p57_p0 }
   0x7   :  { %65 = shalt.err (!%p62_p2)
}
   0x8   :  { %s66_s15 = scalar_lea.vmem %s14_s7, 256  ;;  %p71_p4 = scmp.lt.s32.totalorder %s14_s7, %s14_s7 }
   0x9   :  { %p67_p3 = scmp.ne.s32.totalorder %s14_s7, %s66_s15  ;;  %p72_p5 = scmp.lt.s32.totalorder %s66_s15, %s66_s15 }
   0xb   :  { %p73_p6 = por %p72_p5, %p71_p4 }
   0xd   :  { %p74_p7 = pnand %p73_p6, %p67_p3 }
   0xf   :  { %77 = shalt.err (!%p74_p7)
}
  0x10   :  { %s105_s16 = smov 128   ;;  %s106_s17 = smov 8  }
  0x11   :  { %19 = dma.hbm_to_vmem [thread:$0]  %s148_s0, 256, %s14_s7, [#allocation3], %s105_s16, %s105_s16, %s106_s17  }
  0x12   :  { %100 = dma.done.wait [#allocation3], 256  }
  0x13   :  { %101 = vsyncadd [#allocation3], 4294967040  ;;  %v23_v0 = vld [vmem:[#allocation2] sm:$0xff]  ;;  %v24_v1 = vld [vmem:[#allocation2 + $0x8] sm:$0xff]  ;;  %s107_s20 = smov [#allocation5]  }
  0x14   :  { %v25_v2 = vmax.f32 %v23_v0, 0.0  ;;  %v26_v3 = vmax.f32 %v24_v1, 0.0  ;;  %s40_s21 = sshll.u32 %s107_s20, 4  ;;  %s41_s21 = int_to_ptr.vmem [resolvable:$true] %s40_s21 }
  0x15   :  { %s78_s22 = scalar_lea.vmem %s41_s21, 256  ;;  %p83_p9 = scmp.lt.s32.totalorder %s41_s21, %s41_s21 }
  0x16   :  { %v27_v4 = vmin.f32 %v25_v2, 1.0  ;;  %v28_v5 = vmin.f32 %v26_v3, 1.0  ;;  %p79_p8 = scmp.ne.s32.totalorder %s41_s21, %s78_s22  ;;  %p84_p10 = scmp.lt.s32.totalorder %s78_s22, %s78_s22 }
  0x18   :  { %v29_v6 = vmul.f32 5.0, %v27_v4  ;;  %v30_v7 = vmul.f32 5.0, %v28_v5  ;;  %p85_p11 = por %p84_p10, %p83_p9 }
  0x1a   :  { %v31_v8 = vadd.f32 -2.0, %v29_v6  ;;  %v32_v9 = vadd.f32 -2.0, %v30_v7  ;;  %p86_p12 = pnand %p85_p11, %p79_p8 }
  0x1c   :  { %33 = vst [vmem:[#allocation5] sm:$0xff] %v31_v8  ;;  %34 = vst [vmem:[#allocation5 + $0x8] sm:$0xff] %v32_v9 }
  0x1d   :  { %89 = shalt.err (!%p86_p12)
}
  0x1e   :  { %s90_s24 = scalar_lea.hbm %s149_s1, 256 }
  0x1f   :  { %p91_p13 = scmp.ne.s32.totalorder %s149_s1, %s90_s24  ;;  %p94_p0 = scmp.lt.u32.totalorder %s90_s24, %s149_s1 }
  0x21   :  { %p96_p1 = pnand %p94_p0, %p91_p13 }
  0x23   :  { %99 = shalt.err (!%p96_p1)
}
  0x24   :  { %46 = dma.vmem_to_hbm [thread:$0]  %s41_s21, 256, %s149_s1, [#allocation4], %s105_s16, %s105_s16, %s106_s17  }
  0x25   :  { %102 = dma.done.wait [#allocation4], 256  }
  0x26   :  { %103 = vsyncadd [#allocation4], 4294967040 }
  0x27   :  { %50 = vsyncpa [#allocation3], 1 }
  0x28   :  { %51 = vsyncpa [#allocation4], 1 }

</bundles_post_ra>
